<compile_context>
chip_gen: v5e
topology: v5e:2x2
jax: 0.10.0
libtpu: 0.0.40
codegen_flags: <defaults>
</compile_context>

<pallas_src>
import functools

import jax
import jax.numpy as jnp
from jax.experimental import pallas as pl
from jax.experimental.pallas import tpu as pltpu

LANES = 128
MAX_TILE_BYTES = 2 * 1024 * 1024   # per-input block size target (f32: 4096 x 128)


def _round_up(x, m):
    return ((x + m - 1) // m) * m


def _adaptive_mse_kernel(pred_ref, real_ref, out_ref, *, rows, block_rows):
    i = pl.program_id(0)

    # (8, 128) f32 accumulator resident in the output block across the grid.
    @pl.when(i == 0)
    def _init():
        out_ref[...] = jnp.zeros_like(out_ref)

    def _accumulate(mask_rows):
        p = pred_ref[...].astype(jnp.float32)
        r = real_ref[...].astype(jnp.float32)
        d = p - r
        # reciprocal keeps parity with the reference divide while offloading
        # work from the VALU divide sequence; the kernel stays DMA-bound.
        val = (d * d) * pl.reciprocal(jnp.sqrt(r) + 1.0, approx=False)
        if mask_rows:
            # Only the ragged last block pays for the iota/compare/select.
            row0 = i * block_rows
            row_ids = row0 + jax.lax.broadcasted_iota(jnp.int32, val.shape, 0)
            val = jnp.where(row_ids < rows, val, 0.0)  # select: NaN-safe
        # Pure-VPU sublane-aligned reduce: (block_rows,128)->(bh,8,128)->(8,128)
        out_ref[...] += jnp.sum(
            val.reshape(block_rows // 8, 8, LANES), axis=0)

    if rows % block_rows == 0:
        # No ragged block at all: steady-state path everywhere, no masking.
        _accumulate(False)
    else:
        last = pl.num_programs(0) - 1

        @pl.when(i != last)
        def _main():
            _accumulate(False)

        @pl.when(i == last)
        def _ragged():
            _accumulate(True)


def adaptive_mse_loss(y_pred, y_real):
    """sum((y_pred - y_real)^2 / (sqrt(y_real) + 1)) via a Pallas TPU kernel."""
    assert y_pred.shape == y_real.shape
    pred_flat = y_pred.reshape(-1)
    real_flat = y_real.reshape(-1)
    n = pred_flat.shape[0]

    rows = n // LANES
    n_main = rows * LANES
    tail = n - n_main

    # Tiny ragged tail (< 128 elements) in plain JAX.
    # TODO(synk): when n % 128 != 0 the prefix slice below may materialize a
    # copy of the inputs; acceptable here, revisit with a 1D BlockSpec if hot.
    tail_sum = None
    if tail:
        pt = pred_flat[n_main:].astype(jnp.float32)
        rt = real_flat[n_main:].astype(jnp.float32)
        tail_sum = jnp.sum((pt - rt) ** 2 / (jnp.sqrt(rt) + 1.0))

    if rows == 0:
        return tail_sum if tail_sum is not None else jnp.float32(0.0)

    if tail:
        pred_main = pred_flat[:n_main]
        real_main = real_flat[:n_main]
    else:
        pred_main = pred_flat
        real_main = real_flat

    # Lane-dense 2D view in the native input dtype (upcast happens on-chip).
    pred2d = pred_main.reshape(rows, LANES)
    real2d = real_main.reshape(rows, LANES)

    # Dtype-aware tiling: sublane pack multiple (8 f32 / 16 bf16 / 32 int8)
    # and roughly constant bytes per block so the DMA per step stays large.
    itemsize = max(jnp.dtype(pred2d.dtype).itemsize,
                   jnp.dtype(real2d.dtype).itemsize)
    pack = 8 * max(1, 4 // itemsize)
    max_rows = MAX_TILE_BYTES // (LANES * itemsize)
    max_rows = max(pack, (max_rows // pack) * pack)
    block_rows = min(max_rows, _round_up(rows, pack))
    num_blocks = pl.cdiv(rows, block_rows)
    grid = (num_blocks,)

    kernel = functools.partial(
        _adaptive_mse_kernel,
        rows=rows,
        block_rows=block_rows,
    )

    bytes_in = n_main * (jnp.dtype(pred2d.dtype).itemsize
                         + jnp.dtype(real2d.dtype).itemsize)
    cost = pl.CostEstimate(
        flops=5 * n_main,
        transcendentals=2 * n_main,
        bytes_accessed=bytes_in + 8 * LANES * 4,
    )

    partials = pl.pallas_call(
        kernel,
        out_shape=jax.ShapeDtypeStruct((8, LANES), jnp.float32),
        grid_spec=pltpu.PrefetchScalarGridSpec(
            num_scalar_prefetch=0,
            grid=grid,
            in_specs=[
                pl.BlockSpec((block_rows, LANES), lambda i: (i, 0)),
                pl.BlockSpec((block_rows, LANES), lambda i: (i, 0)),
            ],
            # Output block == full (8, 128) array -> vreg-aligned, unmasked
            # stores, resident accumulator across the reduction axis.
            out_specs=pl.BlockSpec((8, LANES), lambda i: (0, 0)),
        ),
        compiler_params=pltpu.CompilerParams(
            dimension_semantics=("arbitrary",),
        ),
        cost_estimate=cost,
    )(pred2d, real2d)

    # Single cross-sublane + cross-lane reduction, outside the hot loop.
    result = jnp.sum(partials)
    if tail_sum is not None:
        result = result + tail_sum
    return result


if __name__ == "__main__":
    key = jax.random.PRNGKey(0)
    k1, k2 = jax.random.split(key)

    # small NCHW inputs; y_real kept positive so sqrt is well-defined
    shape = (2, 4, 16, 16)
    y_pred = jax.random.normal(k1, shape, dtype=jnp.float32)
    y_real = jax.random.uniform(k2, shape, dtype=jnp.float32, minval=0.0, maxval=2.0)

    loss = adaptive_mse_loss(y_pred, y_real)
    loss = jax.block_until_ready(loss)

    # reference check in plain JAX
    ref = jnp.sum((y_pred - y_real) ** 2 / (jnp.sqrt(y_real) + 1.0))
    assert jnp.allclose(loss, ref, rtol=1e-5, atol=1e-5), (loss, ref)

    print("KERNEL_OK")
</pallas_src>

<mosaic_0001>
module attributes {stable_mosaic.version = 11 : i64} {
  func.func @_adaptive_mse_kernel(%arg0: i32, %arg1: memref<16x128xf32, #tpu.memory_space<vmem>>, %arg2: memref<16x128xf32, #tpu.memory_space<vmem>>, %arg3: memref<8x128xf32, #tpu.memory_space<vmem>>) attributes {dimension_semantics = [#tpu.dimension_semantics<arbitrary>], iteration_bounds = array<i64: 1>, scalar_prefetch = 0 : i64, scratch_operands = 0 : i64, tpu.core_type = #tpu.core_type<tc>, window_params = [{transform_indices = @transform_0, window_bounds = array<i64: 16, 128>}, {transform_indices = @transform_1, window_bounds = array<i64: 16, 128>}, {pipeline_mode = #tpu.pipeline_mode<synchronous>, transform_indices = @transform_2, window_bounds = array<i64: 8, 128>}]} {
    %c0_i32 = arith.constant 0 : i32
    %0 = arith.cmpi eq, %arg0, %c0_i32 : i32
    %1 = arith.extui %0 : i1 to i32
    %c0_i32_0 = arith.constant 0 : i32
    %2 = arith.cmpi ne, %1, %c0_i32_0 : i32
    scf.if %2 {
      %cst_9 = arith.constant 0.000000e+00 : f32
      %17 = vector.broadcast %cst_9 : f32 to vector<8x128xf32>
      %c0_10 = arith.constant 0 : index
      %c0_11 = arith.constant 0 : index
      %18 = vector.load %arg3[%c0_10, %c0_11] : memref<8x128xf32, #tpu.memory_space<vmem>>, vector<8x128xf32>
      tpu.vector_store %arg3[%c0_10, %c0_11], %17 {strides = array<i32>} : memref<8x128xf32, #tpu.memory_space<vmem>>, vector<8x128xf32>,
    } else {
    }
    %c0 = arith.constant 0 : index
    %c0_1 = arith.constant 0 : index
    %3 = vector.load %arg1[%c0, %c0_1] : memref<16x128xf32, #tpu.memory_space<vmem>>, vector<16x128xf32>
    %c0_2 = arith.constant 0 : index
    %c0_3 = arith.constant 0 : index
    %4 = vector.load %arg2[%c0_2, %c0_3] : memref<16x128xf32, #tpu.memory_space<vmem>>, vector<16x128xf32>
    %5 = arith.subf %3, %4 : vector<16x128xf32>
    %6 = arith.mulf %5, %5 : vector<16x128xf32>
    %7 = math.sqrt %4 : vector<16x128xf32>
    %cst = arith.constant 1.000000e+00 : f32
    %8 = vector.broadcast %cst : f32 to vector<16x128xf32>
    %9 = arith.addf %7, %8 : vector<16x128xf32>
    %10 = tpu.reciprocal %9 : vector<16x128xf32> -> vector<16x128xf32>
    %11 = arith.mulf %6, %10 : vector<16x128xf32>
    %c0_4 = arith.constant 0 : index
    %c0_5 = arith.constant 0 : index
    %12 = vector.load %arg3[%c0_4, %c0_5] : memref<8x128xf32, #tpu.memory_space<vmem>>, vector<8x128xf32>
    %13 = vector.shape_cast %11 : vector<16x128xf32> to vector<2x8x128xf32>
    %cst_6 = arith.constant dense<0.000000e+00> : vector<8x128xf32>
    %14 = vector.multi_reduction <add>, %13, %cst_6 [0] : vector<2x8x128xf32> to vector<8x128xf32>
    %15 = arith.addf %12, %14 : vector<8x128xf32>
    %c0_7 = arith.constant 0 : index
    %c0_8 = arith.constant 0 : index
    %16 = vector.load %arg3[%c0_7, %c0_8] : memref<8x128xf32, #tpu.memory_space<vmem>>, vector<8x128xf32>
    tpu.vector_store %arg3[%c0_7, %c0_8], %15 {strides = array<i32>} : memref<8x128xf32, #tpu.memory_space<vmem>>, vector<8x128xf32>,
    return
  }
  func.func @transform_0(%arg0: i32) -> (i32, i32) {
    %c0_i32 = arith.constant 0 : i32
    %c0_i32_0 = arith.constant 0 : i32
    return %arg0, %c0_i32 : i32, i32
  }
  func.func @transform_1(%arg0: i32) -> (i32, i32) {
    %c0_i32 = arith.constant 0 : i32
    %c0_i32_0 = arith.constant 0 : i32
    return %arg0, %c0_i32 : i32, i32
  }
  func.func @transform_2(%arg0: i32) -> (i32, i32) {
    %c0_i32 = arith.constant 0 : i32
    %c0_i32_0 = arith.constant 0 : i32
    %c0_i32_1 = arith.constant 0 : i32
    return %c0_i32, %c0_i32_0 : i32, i32
  }
}

</mosaic_0001>

<bundles_post_ra>
// kernel: tpu_custom_call.1
= control target key start
LH: loop header
LB: loop body
LE: loop exit
PB: predicated region body
PF: predicated region fallthrough
CT: control target
= control target key end

     0   :  { %7 = vsyncpa [#allocation3], 0  ;;  %s256_s0 = inlined_call_operand.hbm [shape: f32[16,128], index: 0, kind: input, shape index: {}]   ;;  %s257_s1 = inlined_call_operand.hbm [shape: f32[16,128], index: 1, kind: input, shape index: {}]   ;;  %s258_s2 = inlined_call_operand.hbm [shape: f32[8,128], index: 2, kind: output, shape index: {}]  }
   0x1   :  { %8 = vsyncpa [#allocation6], 0 }
   0x2   :  { %9 = vsyncpa [#allocation4], 0  ;;  %s14_s11 = sshll.u32 %s256_s0, 4  ;;  %s227_s12 = smov [#allocation2]   ;;  %s15_s11 = int_to_ptr.hbm [resolvable:$true] %s14_s11 }
   0x3   :  { %s16_s13 = sshll.u32 %s227_s12, 4  ;;  %s27_s16 = sshll.u32 %s257_s1, 4  ;;  %s17_s13 = int_to_ptr.vmem [resolvable:$true] %s16_s13  ;;  %s28_s16 = int_to_ptr.hbm [resolvable:$true] %s27_s16 }
   0x4   :  { %s228_s17 = smov 128   ;;  %s229_s18 = smov 8  }
   0x5   :  { %22 = dma.hbm_to_vmem [thread:$0]  %s15_s11, 256, %s17_s13, [#allocation3], %s228_s17, %s228_s17, %s229_s18  }
   0x6   :  { %s230_s19 = smov [#allocation5]  }
   0x7   :  { %s29_s20 = sshll.u32 %s230_s19, 4  ;;  %s30_s20 = int_to_ptr.vmem [resolvable:$true] %s29_s20 }
   0x8   :  { %35 = dma.hbm_to_vmem [thread:$0]  %s28_s16, 256, %s30_s20, [#allocation6], %s228_s17, %s228_s17, %s229_s18  }
   0x9   :  { %221 = dma.done.wait [#allocation3], 256  }
   0xa   :  { %222 = vsyncadd [#allocation3], 4294967040 }
   0xb   :  { %223 = dma.done.wait [#allocation6], 256  }
   0xc   :  { %224 = vsyncadd [#allocation6], 4294967040  ;;  %v51_v0 = vld [vmem:[#allocation5] sm:$0xff]  ;;  %v52_v1 = vld [vmem:[#allocation5 + $0x8] sm:$0xff]  ;;  %s231_s0 = smov [#allocation7]   ;;  %s124_s23 = sshll.u32 %s258_s2, 4  ;;  %s125_s23 = int_to_ptr.hbm [resolvable:$true] %s124_s23 }
   0xd   :  { %141 = vrsqrt.f32 %v51_v0  ;;  %vm64_vm0 = vcmp.eq.f32.partialorder %v51_v0, inf  ;;  %v67_v13 = vand.u32 2147483648, %v51_v0  ;;  %vm66_vm1 = vcmp.eq.f32.partialorder %v51_v0, 0.0  ;;  %v49_v24 = vld [vmem:[#allocation2] sm:$0xff]  ;;  %v50_v25 = vld [vmem:[#allocation2 + $0x8] sm:$0xff]  ;;  %s122_s1 = sshll.u32 %s231_s0, 4  ;;  %s123_s1 = int_to_ptr.vmem [resolvable:$true] %s122_s1 }
   0xe   :  { %143 = vrsqrt.f32 %v52_v1  ;;  %vm76_vm2 = vcmp.eq.f32.partialorder %v52_v1, inf  ;;  %v79_v16 = vand.u32 2147483648, %v52_v1  ;;  %vm78_vm3 = vcmp.eq.f32.partialorder %v52_v1, 0.0 }
   0xf   :  { %v53_v28 = vsub.f32 %v49_v24, %v51_v0  ;;  %v54_v30 = vsub.f32 %v50_v25, %v52_v1 }
  0x11   :  { %v55_v41 = vmul.f32 %v53_v28, %v53_v28  ;;  %v56_v44 = vmul.f32 %v54_v30, %v54_v30 }
  0x13   :  { %v142_v2 = vpop.eup %141 }
  0x14   :  { %v144_v3 = vpop.eup %143  ;;  %v58_v4 = vmul.f32 %v142_v2, %v51_v0 }
  0x15   :  { %v70_v5 = vmul.f32 %v144_v3, %v52_v1 }
  0x16   :  { %v59_v6 = vmul.f32 %v142_v2, %v58_v4 }
  0x17   :  { %v71_v7 = vmul.f32 %v144_v3, %v70_v5 }
  0x18   :  { %v60_v8 = vmul.f32 0.5, %v59_v6 }
  0x19   :  { %v72_v9 = vmul.f32 0.5, %v71_v7 }
  0x1a   :  { %v61_v10 = vsub.f32 1.5, %v60_v8 }
  0x1b   :  { %v73_v11 = vsub.f32 1.5, %v72_v9 }
  0x1c   :  { %v62_v12 = vmul.f32 %v142_v2, %v61_v10 }
  0x1d   :  { %v74_v14 = vmul.f32 %v144_v3, %v73_v11 }
  0x1e   :  { %v63_v15 = vmul.f32 %v62_v12, %v51_v0 }
  0x1f   :  { %v75_v17 = vmul.f32 %v74_v14, %v52_v1 }
  0x20   :  { %v65_v18 = vsel %vm64_vm0, %v51_v0, %v63_v15 }
  0x21   :  { %v68_v19 = vsel %vm66_vm1, %v67_v13, %v65_v18  ;;  %v77_v20 = vsel %vm76_vm2, %v52_v1, %v75_v17 }
  0x22   :  { %v80_v21 = vsel %vm78_vm3, %v79_v16, %v77_v20  ;;  %v81_v22 = vadd.f32 1.0, %v68_v19 }
  0x23   :  { %v82_v23 = vadd.f32 1.0, %v80_v21 }
  0x24   :  { %145 = vrcp.f32 %v81_v22  ;;  %vm88_vm4 = vweird.f32 %v81_v22  ;;  %v94_v31 = vand.u32 2147483648, %v81_v22  ;;  %v92_v34 = vand.u32 2147483647, %v81_v22 }
  0x25   :  { %147 = vrcp.f32 %v82_v23  ;;  %v108_v35 = vand.u32 2147483648, %v82_v23  ;;  %vm102_vm6 = vweird.f32 %v82_v23  ;;  %v106_v37 = vand.u32 2147483647, %v82_v23 }
  0x26   :  { %v95_v39 = vor.u32 1.1754944e-38, %v94_v31  ;;  %vm93_vm9 = vcmp.eq.f32.partialorder %v92_v34, 8.507059e+37 }
  0x27   :  { %v109_v43 = vor.u32 1.1754944e-38, %v108_v35  ;;  %vm107_vm11 = vcmp.eq.f32.partialorder %v106_v37, 8.507059e+37 }
  0x2a   :  { %v146_v26 = vpop.eup %145 }
  0x2b   :  { %v148_v27 = vpop.eup %147  ;;  %v84_v29 = vmul.f32 %v146_v26, %v81_v22  ;;  %vm89_vm5 = vweird.f32 %v146_v26 }
  0x2c   :  { %v98_v32 = vmul.f32 %v148_v27, %v82_v23  ;;  %vm103_vm7 = vweird.f32 %v148_v27  ;;  %vm90_vm8 = vmor %vm88_vm4, %vm89_vm5 }
  0x2d   :  { %v85_v33 = vsub.f32 1.0, %v84_v29  ;;  %vm104_vm10 = vmor %vm102_vm6, %vm103_vm7 }
  0x2e   :  { %v99_v36 = vsub.f32 1.0, %v98_v32 }
  0x2f   :  { %v86_v38 = vmul.f32 %v146_v26, %v85_v33 }
  0x30   :  { %v100_v40 = vmul.f32 %v148_v27, %v99_v36 }
  0x31   :  { %v87_v42 = vadd.f32 %v146_v26, %v86_v38 }
  0x32   :  { %v101_v45 = vadd.f32 %v148_v27, %v100_v40 }
  0x33   :  { %v91_v46 = vsel %vm90_vm8, %v146_v26, %v87_v42 }
  0x34   :  { %v96_v47 = vsel %vm93_vm9, %v95_v39, %v91_v46  ;;  %v105_v48 = vsel %vm104_vm10, %v148_v27, %v101_v45 }
  0x35   :  { %v110_v49 = vsel %vm107_vm11, %v109_v43, %v105_v48  ;;  %v111_v50 = vmul.f32 %v96_v47, %v55_v41 }
  0x36   :  { %v112_v51 = vmul.f32 %v110_v49, %v56_v44 }
  0x38   :  { %v114_v52 = vadd.f32 %v112_v51, %v111_v50 }
  0x3a   :  { %116 = vst [vmem:[#allocation7] sm:$0xff] %v114_v52 }
  0x3b   :  { %127 = dma.vmem_to_hbm [thread:$0]  %s123_s1, 128, %s125_s23, [#allocation4]  }
  0x3c   :  { %225 = dma.done.wait [#allocation4], 128  }
  0x3d   :  { %226 = vsyncadd [#allocation4], 4294967168 }
  0x3e   :  { %132 = vsyncpa [#allocation3], 1 }
  0x3f   :  { %133 = vsyncpa [#allocation6], 1 }
  0x40   :  { %134 = vsyncpa [#allocation4], 1 }

</bundles_post_ra>
